<compile_context>
chip_gen: v7x
topology: tpu7x:2x2x1
jax: 0.10.0
libtpu: 0.0.40
codegen_flags: <defaults>
</compile_context>

<pallas_src>
import numpy as np
import jax
import jax.numpy as jnp
from jax import lax
from jax.experimental import pallas as pl
from jax.experimental.pallas import tpu as pltpu


def linear_memory_kernel(delays_ref, x_ref, buf_ref, w_ref, y_ref, new_buf_ref):
    """All refs live in VMEM.

    delays_ref : (1, n_in) int32   delay per input
    x_ref      : (1, n_in) f32     current input vector
    buf_ref    : (D, n_in) f32     time-major delay buffer (row c == buffer[:, c])
    w_ref      : (n_in, tn)        one n_out-tile of the pre-transposed weights
    y_ref      : (1, tn)   f32     output tile
    new_buf_ref: (D, n_in) f32     updated delay buffer (same block every grid step)
    """
    d, n_in = buf_ref.shape

    # --- step 1: roll(-1) along the delay axis == XLU sublane rotate (cheap) ---
    # shift = d - 1 is the non-negative equivalent of shift = -1 (np.roll semantics).
    rolled = pltpu.roll(buf_ref[...], shift=d - 1, axis=0)

    # --- step 2: vectorized "last writer wins" scatter -------------------------
    # buffer[:, delays[j]] = x[j]  ==>  row delays[j] of the (D, n_in) buffer is
    # filled with the scalar x[j]; on duplicate delays the largest j wins.
    delays = delays_ref[...]                                   # (1, n_in)
    x = x_ref[...]                                             # (1, n_in)
    row_ids = lax.broadcasted_iota(jnp.int32, (d, n_in), 0)    # delay-row index c
    j_ids = lax.broadcasted_iota(jnp.int32, (d, n_in), 1)      # writer index j
    hit = delays == row_ids                                    # (d, n_in): j writes row c
    # Last writer per row (-1 if the row is not written).  Lane-axis reduce.
    last_writer = jnp.max(jnp.where(hit, j_ids, -1), axis=1, keepdims=True)   # (d, 1)
    written = last_writer >= 0                                                # (d, 1)
    # Exactly one lane per written row matches last_writer, so the masked sum
    # picks x[last_writer] exactly (no float accumulation issues).
    is_last = hit & (j_ids == last_writer)                                    # (d, n_in)
    row_val = jnp.sum(jnp.where(is_last, x, 0.0), axis=1, keepdims=True)      # (d, 1)
    new_buf = jnp.where(written, row_val, rolled)                             # (d, n_in)
    new_buf_ref[...] = new_buf

    # --- step 3: y tile = buffer[:, 0] @ W^T tile  (lane-dense (1, tn) store) ---
    w = w_ref[...]
    row0 = new_buf[0:1, :].astype(w.dtype)                     # (1, n_in)
    y_ref[...] = jnp.dot(row0, w, preferred_element_type=jnp.float32).astype(y_ref.dtype)


def linear_memory_forward_t(x, buffer_t, weights_t, delays, *, tn=256):
    """Hot-path functional forward in the transposed working layout.

    x        : (n_in,)        float32
    buffer_t : (D, n_in)      float32     time-major buffer state
    weights_t: (n_in, n_out)  float32/bf16 (pre-transposed ONCE, outside the step loop)
    delays   : (n_in,)        int32
    returns (y: (n_out,) float32, new_buffer_t: (D, n_in) float32)
    """
    d, n_in = buffer_t.shape
    n_out = weights_t.shape[1]
    tn = min(tn, n_out)
    grid = (pl.cdiv(n_out, tn),)

    x2 = x.reshape(1, n_in).astype(buffer_t.dtype)
    delays2 = delays.reshape(1, n_in).astype(jnp.int32)

    y2, new_buf_t = pl.pallas_call(
        linear_memory_kernel,
        out_shape=(
            jax.ShapeDtypeStruct((1, n_out), jnp.float32),
            jax.ShapeDtypeStruct((d, n_in), buffer_t.dtype),
        ),
        grid=grid,
        in_specs=[
            pl.BlockSpec((1, n_in), lambda j: (0, 0)),      # delays (VMEM, used vector-wise)
            pl.BlockSpec((1, n_in), lambda j: (0, 0)),      # x      (VMEM, used vector-wise)
            pl.BlockSpec((d, n_in), lambda j: (0, 0)),      # buffer (full, stays resident)
            pl.BlockSpec((n_in, tn), lambda j: (0, j)),     # streamed weight tile
        ],
        out_specs=(
            pl.BlockSpec((1, tn), lambda j: (0, j)),        # y tile (lane-dense store)
            pl.BlockSpec((d, n_in), lambda j: (0, 0)),      # updated buffer
        ),
        compiler_params=pltpu.CompilerParams(
            dimension_semantics=("parallel",),              # 2 TCs on v7x; no-op on v5e/v6e
            vmem_limit_bytes=32 * 1024 * 1024,
        ),
    )(delays2, x2, buffer_t, weights_t)
    return y2[0], new_buf_t


def linear_memory_forward(x, buffer, weights, delays, *, tn=256):
    """Module-layout convenience wrapper: buffer (n_in, D), weights (n_out, n_in)."""
    y, new_buf_t = linear_memory_forward_t(
        x, jnp.transpose(buffer), jnp.transpose(weights), delays, tn=tn)
    return y, jnp.transpose(new_buf_t)


def reference_forward(x, buffer, weights, delays):
    """Pure-numpy replica of the PyTorch semantics for verification."""
    buf = np.roll(np.asarray(buffer, dtype=np.float64), -1, axis=1)
    xv = np.asarray(x, dtype=np.float64)
    dl = np.asarray(delays)
    for j in range(xv.shape[0]):
        buf[:, int(dl[j])] = xv[j]          # column broadcast, last write wins
    y = np.asarray(weights, dtype=np.float64) @ buf[:, 0]
    return y, buf


if __name__ == "__main__":
    n_in, n_out = 128, 512
    max_delay = 15
    D = max_delay + 1
    n_steps = 4

    key = jax.random.PRNGKey(0)
    k_w, k_x, k_d = jax.random.split(key, 3)

    delays = jax.random.randint(k_d, (n_in,), 0, max_delay + 1, dtype=jnp.int32)
    delays = delays.at[0].set(max_delay)                      # pin buffer depth to D
    weights = jax.random.normal(k_w, (n_out, n_in), dtype=jnp.float32)
    xs = jax.random.normal(k_x, (n_steps, n_in), dtype=jnp.float32)

    # Working-layout state prepared once (weights transposed once, buffer time-major).
    weights_t = jnp.transpose(weights)                        # (n_in, n_out)
    buf_t = jnp.zeros((D, n_in), dtype=jnp.float32)
    delays_np = np.asarray(delays)

    step = jax.jit(lambda xv, bt: linear_memory_forward_t(xv, bt, weights_t, delays, tn=256))

    buf_ref = np.zeros((n_in, D), dtype=np.float64)
    for t in range(n_steps):
        y, buf_t = step(xs[t], buf_t)
        jax.block_until_ready((y, buf_t))
        y_ref, buf_ref = reference_forward(np.asarray(xs[t]), buf_ref,
                                           np.asarray(weights), delays_np)
        assert np.allclose(np.asarray(y), y_ref, rtol=1e-4, atol=1e-3), \
            f"output mismatch at step {t}"
        assert np.allclose(np.asarray(buf_t).T, buf_ref, atol=1e-6), \
            f"buffer mismatch at step {t}"

    # Module-layout wrapper sanity check (single step from a fresh zero buffer).
    y0, new_buf0 = linear_memory_forward(xs[0], jnp.zeros((n_in, D), jnp.float32),
                                         weights, delays)
    jax.block_until_ready((y0, new_buf0))
    y0_ref, buf0_ref = reference_forward(np.asarray(xs[0]), np.zeros((n_in, D)),
                                         np.asarray(weights), delays_np)
    assert np.allclose(np.asarray(y0), y0_ref, rtol=1e-4, atol=1e-3), "wrapper output mismatch"
    assert np.allclose(np.asarray(new_buf0), buf0_ref, atol=1e-6), "wrapper buffer mismatch"

    print("KERNEL_OK")
</pallas_src>

<mosaic_0001>
module attributes {stable_mosaic.version = 11 : i64} {
  func.func @linear_memory_kernel(%arg0: i32, %arg1: memref<1x128xi32, #tpu.memory_space<vmem>>, %arg2: memref<1x128xf32, #tpu.memory_space<vmem>>, %arg3: memref<16x128xf32, #tpu.memory_space<vmem>>, %arg4: memref<128x256xf32, #tpu.memory_space<vmem>>, %arg5: memref<1x256xf32, #tpu.memory_space<vmem>>, %arg6: memref<16x128xf32, #tpu.memory_space<vmem>>) attributes {dimension_semantics = [#tpu.dimension_semantics<parallel>], iteration_bounds = array<i64: 2>, scalar_prefetch = 0 : i64, scratch_operands = 0 : i64, tpu.core_type = #tpu.core_type<tc>, window_params = [{pipeline_mode = #tpu.pipeline_mode<synchronous>, transform_indices = @transform_0, window_bounds = array<i64: 1, 128>}, {pipeline_mode = #tpu.pipeline_mode<synchronous>, transform_indices = @transform_1, window_bounds = array<i64: 1, 128>}, {pipeline_mode = #tpu.pipeline_mode<synchronous>, transform_indices = @transform_2, window_bounds = array<i64: 16, 128>}, {transform_indices = @transform_3, window_bounds = array<i64: 128, 256>}, {transform_indices = @transform_4, window_bounds = array<i64: 1, 256>}, {pipeline_mode = #tpu.pipeline_mode<synchronous>, transform_indices = @transform_5, window_bounds = array<i64: 16, 128>}]} {
    %c0 = arith.constant 0 : index
    %c0_0 = arith.constant 0 : index
    %0 = vector.load %arg3[%c0, %c0_0] : memref<16x128xf32, #tpu.memory_space<vmem>>, vector<16x128xf32>
    %c15_i32 = arith.constant 15 : i32
    %1 = tpu.dynamic_rotate %0 by %c15_i32 dim 0 : vector<16x128xf32>, i32 -> vector<16x128xf32>
    %c0_1 = arith.constant 0 : index
    %c0_2 = arith.constant 0 : index
    %2 = vector.load %arg1[%c0_1, %c0_2] : memref<1x128xi32, #tpu.memory_space<vmem>>, vector<1x128xi32>
    %c0_3 = arith.constant 0 : index
    %c0_4 = arith.constant 0 : index
    %3 = vector.load %arg2[%c0_3, %c0_4] : memref<1x128xf32, #tpu.memory_space<vmem>>, vector<1x128xf32>
    %4 = tpu.iota {dimensions = array<i32: 0>} : vector<16x128xi32>
    %5 = tpu.iota {dimensions = array<i32: 1>} : vector<16x128xi32>
    %6 = vector.broadcast %2 : vector<1x128xi32> to vector<16x128xi32>
    %7 = arith.cmpi eq, %6, %4 : vector<16x128xi32>
    %c-1_i32 = arith.constant -1 : i32
    %8 = vector.broadcast %c-1_i32 : i32 to vector<16x128xi32>
    %9 = arith.select %7, %5, %8 : vector<16x128xi1>, vector<16x128xi32>
    %cst = arith.constant dense<-2147483648> : vector<16xi32>
    %10 = vector.multi_reduction <maxsi>, %9, %cst [1] : vector<16x128xi32> to vector<16xi32>
    %11 = vector.shape_cast %10 : vector<16xi32> to vector<16x1xi32>
    %c0_i32 = arith.constant 0 : i32
    %12 = vector.broadcast %c0_i32 : i32 to vector<16x1xi32>
    %13 = arith.cmpi sge, %11, %12 : vector<16x1xi32>
    %14 = vector.broadcast %11 : vector<16x1xi32> to vector<16x128xi32>
    %15 = arith.cmpi eq, %5, %14 : vector<16x128xi32>
    %16 = arith.andi %7, %15 : vector<16x128xi1>
    %cst_5 = arith.constant 0.000000e+00 : f32
    %17 = vector.shape_cast %3 : vector<1x128xf32> to vector<1x128xf32>
    %18 = vector.broadcast %17 : vector<1x128xf32> to vector<16x128xf32>
    %19 = vector.broadcast %cst_5 : f32 to vector<16x128xf32>
    %20 = arith.select %16, %18, %19 : vector<16x128xi1>, vector<16x128xf32>
    %cst_6 = arith.constant dense<0.000000e+00> : vector<16xf32>
    %21 = vector.multi_reduction <add>, %20, %cst_6 [1] : vector<16x128xf32> to vector<16xf32>
    %22 = vector.shape_cast %21 : vector<16xf32> to vector<16x1xf32>
    %23 = vector.shape_cast %13 : vector<16x1xi1> to vector<16x1xi1>
    %24 = vector.broadcast %23 : vector<16x1xi1> to vector<16x128xi1>
    %25 = vector.shape_cast %22 : vector<16x1xf32> to vector<16x1xf32>
    %26 = vector.broadcast %25 : vector<16x1xf32> to vector<16x128xf32>
    %27 = arith.select %24, %26, %1 : vector<16x128xi1>, vector<16x128xf32>
    %c0_7 = arith.constant 0 : index
    %c0_8 = arith.constant 0 : index
    %28 = vector.load %arg6[%c0_7, %c0_8] : memref<16x128xf32, #tpu.memory_space<vmem>>, vector<16x128xf32>
    tpu.vector_store %arg6[%c0_7, %c0_8], %27 {strides = array<i32>} : memref<16x128xf32, #tpu.memory_space<vmem>>, vector<16x128xf32>,
    %c0_9 = arith.constant 0 : index
    %c0_10 = arith.constant 0 : index
    %29 = vector.load %arg4[%c0_9, %c0_10] : memref<128x256xf32, #tpu.memory_space<vmem>>, vector<128x256xf32>
    %30 = vector.extract_strided_slice %27 {offsets = [0, 0], sizes = [1, 128], strides = [1, 1]} : vector<16x128xf32> to vector<1x128xf32>
    %cst_11 = arith.constant dense<0.000000e+00> : vector<1x256xf32>
    %31 = tpu.matmul %30, %29, %cst_11 {dimension_numbers = #tpu.dot_dimension_numbers<[1], [0], [0], [1], [0, 0, 1, 1], [], []>} : vector<1x128xf32>, vector<128x256xf32>, vector<1x256xf32> -> vector<1x256xf32>
    %c0_12 = arith.constant 0 : index
    %c0_13 = arith.constant 0 : index
    %32 = vector.load %arg5[%c0_12, %c0_13] : memref<1x256xf32, #tpu.memory_space<vmem>>, vector<1x256xf32>
    tpu.vector_store %arg5[%c0_12, %c0_13], %31 {strides = array<i32>} : memref<1x256xf32, #tpu.memory_space<vmem>>, vector<1x256xf32>,
    return
  }
  func.func @transform_0(%arg0: i32) -> (i32, i32) {
    %c0_i32 = arith.constant 0 : i32
    %c0_i32_0 = arith.constant 0 : i32
    %c0_i32_1 = arith.constant 0 : i32
    return %c0_i32, %c0_i32_0 : i32, i32
  }
  func.func @transform_1(%arg0: i32) -> (i32, i32) {
    %c0_i32 = arith.constant 0 : i32
    %c0_i32_0 = arith.constant 0 : i32
    %c0_i32_1 = arith.constant 0 : i32
    return %c0_i32, %c0_i32_0 : i32, i32
  }
  func.func @transform_2(%arg0: i32) -> (i32, i32) {
    %c0_i32 = arith.constant 0 : i32
    %c0_i32_0 = arith.constant 0 : i32
    %c0_i32_1 = arith.constant 0 : i32
    return %c0_i32, %c0_i32_0 : i32, i32
  }
  func.func @transform_3(%arg0: i32) -> (i32, i32) {
    %c0_i32 = arith.constant 0 : i32
    %c0_i32_0 = arith.constant 0 : i32
    return %c0_i32, %arg0 : i32, i32
  }
  func.func @transform_4(%arg0: i32) -> (i32, i32) {
    %c0_i32 = arith.constant 0 : i32
    %c0_i32_0 = arith.constant 0 : i32
    return %c0_i32, %arg0 : i32, i32
  }
  func.func @transform_5(%arg0: i32) -> (i32, i32) {
    %c0_i32 = arith.constant 0 : i32
    %c0_i32_0 = arith.constant 0 : i32
    %c0_i32_1 = arith.constant 0 : i32
    return %c0_i32, %c0_i32_0 : i32, i32
  }
}

</mosaic_0001>

<bundles_post_ra>
// kernel: _lambda_.1
= control target key start
LH: loop header
LB: loop body
LE: loop exit
PB: predicated region body
PF: predicated region fallthrough
CT: control target
= control target key end

     0   :  { %11 = vsyncpa [#allocation3], 0  ;;  %s1226_s0 = inlined_call_operand.vmem [shape: s32[1,128], index: 0, kind: input, shape index: {}]   ;;  %s1227_s1 = inlined_call_operand.vmem [shape: f32[1,128], index: 1, kind: input, shape index: {}]   ;;  %s1228_s2 = inlined_call_operand.hbm [shape: f32[16,128], index: 2, kind: input, shape index: {}]   ;;  %s1229_s3 = inlined_call_operand.hbm [shape: f32[128,512], index: 3, kind: input, shape index: {}]   ;;  %s1230_s4 = inlined_call_operand.hbm [shape: f32[1,512], index: 4, kind: output, shape index: {0}]   ;;  %s1231_s5 = inlined_call_operand.hbm [shape: f32[16,128], index: 5, kind: output, shape index: {1}]  }
   0x1   :  { %12 = vsyncpa [#allocation6], 0 }
   0x2   :  { %14 = vsyncpa [#allocation6 + $0x1], 0 }
   0x3   :  { %15 = vsyncpa [#allocation4], 0 }
   0x4   :  { %17 = vsyncpa [#allocation4 + $0x1], 0 }
   0x5   :  { %18 = vsyncpa [#allocation9], 0  ;;  %s912_s18 = smov 0   ;;  %s914_s19 = smov 0  }
   0x6   :  { %s916_s20 = smov 0   ;;  %s918_s21 = smov 0  }
   0x7 LB: > { %s933_s22 = sadd.s32 4294967295, %s867_s21   ;;  %s582_s23 = sadd.s32 4294967294, %s867_s21   ;;  %s867_s21 = sphi %s918_s21, %s1261_s21   ;;  %s863_s20 = sphi %s916_s20, %s1260_s20   ;;  %s859_s19 = sphi %s914_s19, %s1259_s19   ;;  %s855_s18 = sphi %s912_s18, %s1258_s18  }
   0x8   : > { %s937_s24 = sadd.s32 1, %s867_s21   ;;  %s94_s25 = sadd.s32 1, %s863_s20 }
   0x9   : > { %s91_s26 = ssub.s32 %s867_s21, %s937_s24  ;;  %p101_p0 = scmp.ne.s32.totalorder %s863_s20, %s859_s19 }
   0xa   : > { %p92_p1 = scmp.eq.s32.totalorder %s91_s26, 0  ;;  %p102_p2 = scmp.eq.s32.totalorder %s867_s21, 0 }
   0xb   : > { %p107_p3 = scmp.ne.s32.totalorder %s859_s19, %s855_s18  ;;  %p1233_p4 = scmp.eq.s32.totalorder %s933_s22, 0 }
   0xc   : > { %s949_s27 = scalar_select %p92_p1, %s863_s20, %s94_s25  }
   0xd   : > { %p951_p5 = por %p102_p2, %p101_p0  ;;  %p957_p6 = por %p1233_p4, %p107_p3 }
   0xe   : > { %p1232_p7 = scmp.eq.s32.totalorder %s933_s22, 1  ;;  %p137_p8 = scmp.eq.s32.totalorder %s582_s23, 1 }
   0xf   : > { %s1237_s28 = scalar_select %p951_p5, 1, 0 }
  0x10   : > { %s1238_s29 = scalar_select %p957_p6, 1, 0 }
  0x11   : > { %p583_p9 = scmp.ge.s32.totalorder %s867_s21, 1  ;;  %p165_p10 = scmp.lt.s32.totalorder %s867_s21, 3 }
  0x12   : > { %p966_p11 = por %p1232_p7, %p101_p0  ;;  %p970_p12 = por %p137_p8, %p107_p3 }
  0x13   : > { %p974_p13 = pnand %p583_p9, %p165_p10  ;;  %s869_s8 = smov [#allocation2]  }
  0x14   : > { %s1239_s30 = scalar_select %p966_p11, 1, 0 }
  0x15   : > { %s1240_s6 = scalar_select %p970_p12, 1, 0 }
  0x16   : > { %s1241_s7 = scalar_select %p974_p13, 1, 0 }
  0x17   : > { %p648_p1 = pneg %p974_p13  ;;  %s183_s9 = sshll.u32 %s869_s8, 4  ;;  %s184_s9 = int_to_ptr.vmem [resolvable:$true] %s183_s9 }
  0x18   : > { %s197_s11 = sand.u32 1, %s863_s20   ;;  %s709_s14 = scalar_lea.hbm %s1228_s2, 256 }
  0x19   : > { %p982_p2 = pnand %p648_p1, %p1233_p4  ;;  %p710_p8 = scmp.ne.s32.totalorder %s1228_s2, %s709_s14 }
  0x1a   : > { %p716_p1 = scmp.lt.u32.totalorder %s709_s14, %s1228_s2 }
  0x1b   : > { %p711_p9 = pneg %p982_p2 }
  0x1d   : > { %p712_p10 = pnand %p711_p9, %p710_p8 }
  0x1f   : > { %p713_p7 = pneg %p712_p10 }
  0x21   : > { %p718_p4 = pnand %p716_p1, %p713_p7 }
  0x23   : > { %721 = shalt.err (!%p718_p4)
}
  0x24   : > { %s722_s25 = scalar_lea.vmem %s184_s9, 256  ;;  %p730_p11 = scmp.lt.s32.totalorder %s184_s9, %s184_s9 }
  0x25   : > { %p723_p0 = scmp.ne.s32.totalorder %s184_s9, %s722_s25  ;;  %p731_p6 = scmp.lt.s32.totalorder %s722_s25, %s722_s25 }
  0x27   : > { %p725_p3 = pnand %p723_p0, %p711_p9  ;;  %p732_p13 = por %p731_p6, %p730_p11 }
  0x29   : > { %p726_p12 = pneg %p725_p3 }
  0x2b   : > { %p733_p5 = pnand %p732_p13, %p726_p12 }
  0x2d   : > { %736 = shalt.err (!%p733_p5)
}
  0x2e   : > { %s870_s26 = smov 128   ;;  %s871_s8 = smov 8  }
  0x2f   : > { %651 = dma.hbm_to_vmem [thread:$0]  (!%p982_p2), %s1228_s2, 256, %s184_s9, [#allocation3], %s870_s26, %s870_s26, %s871_s8  }
  0x30   : > { %p1243_p4 = scmp.ne.s32.totalorder %s1237_s28, 0  ;;  %p1244_p7 = scmp.lt.s32.totalorder %s867_s21, 2 }
  0x31   : > { %s586_s15 = sshll.u32 %s197_s11, 8  ;;  %s602_s16 = sshll.u32 %s867_s21, 8 }
  0x32   : > { %p1009_p0 = pnand %p1244_p7, %p1243_p4  ;;  %s1017_s25 = scalar_lea.hbm %s1229_s3, %s602_s16 }
  0x33   : > { %s201_s9 = scalar_lea.vmem [#allocation5], %s586_s15  ;;  %s1021_s10 = scalar_lea.sflag [#allocation6], %s197_s11 }
  0x34   : > { %s208_s28 = sshll.u32 %s201_s9, 4  ;;  %s737_s26 = scalar_lea.hbm %s1017_s25, 4096  ;;  %s1019_s28 = int_to_ptr.vmem [resolvable:$true] %s208_s28 }
  0x35   : > { %p738_p5 = scmp.ne.s32.totalorder %s1017_s25, %s737_s26  ;;  %p739_p6 = pneg %p1009_p0 }
  0x36   : > { %s742_s13 = scalar_lea.hbm %s1229_s3, 8192  ;;  %p743_p13 = scmp.lt.u32.totalorder %s1017_s25, %s1229_s3 }
  0x37   : > { %p740_p11 = pnand %p739_p6, %p738_p5  ;;  %p744_p2 = scmp.lt.u32.totalorder %s742_s13, %s737_s26 }
  0x38   : > { %p746_p8 = scmp.lt.u32.totalorder %s737_s26, %s1017_s25 }
  0x39   : > { %p741_p12 = pneg %p740_p11  ;;  %p745_p3 = por %p744_p2, %p743_p13 }
  0x3b   : > { %p747_p9 = por %p746_p8, %p745_p3 }
  0x3d   : > { %p748_p10 = pnand %p747_p9, %p741_p12 }
  0x3f   : > { %751 = shalt.err (!%p748_p10)
}
  0x40   : > { %s752_s11 = scalar_lea.vmem %s1019_s28, 4096  ;;  %s872_s15 = smov [#allocation5]  }
  0x41   : > { %p753_p1 = scmp.ne.s32.totalorder %s1019_s28, %s752_s11  ;;  %s757_s23 = sshll.u32 %s872_s15, 4  ;;  %s758_s23 = int_to_ptr.vmem [resolvable:$false] %s757_s23 }
  0x42   : > { %s759_s9 = scalar_lea.vmem %s758_s23, 8192  ;;  %p760_p5 = scmp.lt.s32.totalorder %s1019_s28, %s758_s23 }
  0x43   : > { %p755_p4 = pnand %p753_p1, %p739_p6  ;;  %p761_p11 = scmp.lt.s32.totalorder %s759_s9, %s752_s11 }
  0x45   : > { %p756_p7 = pneg %p755_p4  ;;  %p762_p13 = por %p761_p11, %p760_p5 }
  0x47   : > { %p763_p2 = pnand %p762_p13, %p756_p7 }
  0x49   : > { %766 = shalt.err (!%p763_p2)
}
  0x4a   : > { %s873_s26 = smov 512   ;;  %s874_s8 = smov 256  }
  0x4b   : > { %s875_s12 = smov 16   ;;  %p1246_p6 = scmp.ne.s32.totalorder %s1241_s7, 0 }
  0x4c   : > { %655 = dma.hbm_to_vmem [thread:$0]  (!%p1009_p0), %s1017_s25, 4096, %s1019_s28, %s1021_s10, %s873_s26, %s874_s8, %s875_s12  }
  0x4d   : > { %220 = sbr.rel (%p1246_p6) target bundleno = 851 (0x353), region = 36  ;;  %p1247_p12 = scmp.eq.s32.totalorder (!%p1246_p6), %s933_s22, 0 }
  0x54   : > { %838 = dma.done.wait (%p1247_p12), [#allocation3], 256   ;;  %p1248_p3 = pmov %p1247_p12 }
  0x55   : > { %s1056_s13 = sand.u32 1, %s859_s19   ;;  %p1249_p0 = scmp.ne.s32.totalorder %s1238_s29, 0 }
  0x56   : > { %840 = vsyncadd (%p1248_p3), [#allocation3], 4294967040  ;;  %s591_s16 = sshll.u32 %s1056_s13, 8  ;;  %s227_s17 = scalar_lea.sflag [#allocation6], %s1056_s13 }
  0x57   : > { %s1060_s11 = scalar_lea.vmem [#allocation5], %s591_s16 }
  0x58   : > { %842 = dma.done.wait (%p1249_p0), %s227_s17, 4096  }
  0x59   : > { %844 = vsyncadd (%p1249_p0), %s227_s17, 4294963200  ;;  %v263_v0 = vlaneseq  ;;  %v1075_v3 = vld [vmem:[%s1226_s0] ss:$0 sm:$0xff]  ;;  %v336_v11 = vld [vmem:[%s1060_s11 + $0x8] sm:$0xff]  ;;  %s592_s28 = sshll.u32 %s1056_s13, 1  ;;  %s603_s10 = sshll.u32 %s933_s22, 5 }
  0x5a   : > { %v338_v12 = vld [vmem:[%s1060_s11 + $0x18] sm:$0xff]  ;;  %v335_v13 = vld [vmem:[%s1060_s11] sm:$0xff]  ;;  %v337_v15 = vld [vmem:[%s1060_s11 + $0x10] sm:$0xff]  ;;  %s254_s15 = scalar_lea.vmem [#allocation7], %s592_s28  ;;  %s1154_s8 = scalar_lea.hbm %s1230_s4, %s603_s10 }
  0x5b   : > { %v1067_v1 = vshrl.u32 %v263_v0, 7  ;;  %v1070_v2 = vand.u32 127, %v263_v0  ;;  %v604_v14 = vpack.c.bf16 %v338_v12, %v336_v11  ;;  %v340_v16 = vld [vmem:[%s1060_s11 + $0x28] sm:$0xff]  ;;  %v342_v17 = vld [vmem:[%s1060_s11 + $0x38] sm:$0xff]  ;;  %v606_v18 = vpack.c.bf16 %v337_v15, %v335_v13  ;;  %v339_v20 = vld [vmem:[%s1060_s11 + $0x20] sm:$0xff]  ;;  %s476_s23 = sshll.u32 %s254_s15, 4  ;;  %s1156_s23 = int_to_ptr.vmem [resolvable:$true] %s476_s23 }
  0x5c   : > { %v608_v19 = vpack.c.bf16 %v342_v17, %v340_v16  ;;  %v341_v21 = vld [vmem:[%s1060_s11 + $0x30] sm:$0xff]  ;;  %v344_v22 = vld [vmem:[%s1060_s11 + $0x48] sm:$0xff]  ;;  %v346_v23 = vld [vmem:[%s1060_s11 + $0x58] sm:$0xff]  ;;  %vm458_vm10 = vcmp.lt.s32.totalorder %v263_v0, 256  ;;  %s462_s12 = scalar_lea.sflag [#allocation4], %s1056_s13  ;;  %s767_s16 = scalar_lea.vmem %s1156_s23, 32 }
  0x5d   : > { %vm277_vm0 = vcmp.eq.s32.totalorder %v1075_v3, %v1067_v1  ;;  %605 = vmatprep.subr.bf16.mxu0 %v604_v14  ;;  %v610_v24 = vpack.c.bf16 %v341_v21, %v339_v20  ;;  %v612_v25 = vpack.c.bf16 %v346_v23, %v344_v22  ;;  %v343_v26 = vld [vmem:[%s1060_s11 + $0x40] sm:$0xff]  ;;  %v345_v27 = vld [vmem:[%s1060_s11 + $0x50] sm:$0xff]  ;;  %v348_v28 = vld [vmem:[%s1060_s11 + $0x68] sm:$0xff]  ;;  %v270_v59 = vadd.s32 8, %v1067_v1  ;;  %p768_p8 = scmp.ne.s32.totalorder %s1156_s23, %s767_s16  ;;  %p1250_p9 = scmp.ne.s32.totalorder %s1239_s30, 0 }
  0x5e   : > { %v279_v4 = vsel %vm277_vm0, %v1070_v2, 4294967295  ;;  %607 = vmatpush1.bf16.msra.mxu0 %v606_v18  ;;  %v350_v29 = vld [vmem:[%s1060_s11 + $0x78] sm:$0xff]  ;;  %v614_v30 = vpack.c.bf16 %v345_v27, %v343_v26  ;;  %v347_v32 = vld [vmem:[%s1060_s11 + $0x60] sm:$0xff]  ;;  %v349_v33 = vld [vmem:[%s1060_s11 + $0x70] sm:$0xff]  ;;  %vm265_vm5 = vcmp.lt.s32.totalorder %v1067_v1, 7  ;;  %s878_s17 = smov [#allocation7]  }
  0x5f   : > { %v282_v5 = vshra.s32 %v279_v4, 16  ;;  %v281_v7 = vand.u32 65535, %v279_v4  ;;  %609 = vmatprep.subr.bf16.mxu0 %v608_v19  ;;  %v616_v31 = vpack.c.bf16 %v350_v29, %v348_v28  ;;  %v352_v34 = vld [vmem:[%s1060_s11 + $0x88] sm:$0xff]  ;;  %v354_v35 = vld [vmem:[%s1060_s11 + $0x98] sm:$0xff]  ;;  %v618_v36 = vpack.c.bf16 %v349_v33, %v347_v32  ;;  %v351_v38 = vld [vmem:[%s1060_s11 + $0x80] sm:$0xff]  ;;  %p769_p10 = pnand %p768_p8, %p1250_p9 }
  0x60   : > { %v620_v37 = vpack.c.bf16 %v354_v35, %v352_v34  ;;  %v353_v39 = vld [vmem:[%s1060_s11 + $0x90] sm:$0xff]  ;;  %v356_v40 = vld [vmem:[%s1060_s11 + $0xa8] sm:$0xff]  ;;  %v358_v41 = vld [vmem:[%s1060_s11 + $0xb8] sm:$0xff]  ;;  %vm278_vm2 = vcmp.eq.s32.totalorder %v1075_v3, %v270_v59  ;;  %v877_v28 = vmov 1966171168  }
  0x61   : > { %v284_v6 = vcvt.s32.f32 %v282_v5  ;;  %v283_v8 = vcvt.s32.f32 %v281_v7  ;;  %v622_v42 = vpack.c.bf16 %v353_v39, %v351_v38  ;;  %v624_v43 = vpack.c.bf16 %v358_v41, %v356_v40  ;;  %v355_v44 = vld [vmem:[%s1060_s11 + $0xa0] sm:$0xff]  ;;  %v357_v45 = vld [vmem:[%s1060_s11 + $0xb0] sm:$0xff]  ;;  %v360_v46 = vld [vmem:[%s1060_s11 + $0xc8] sm:$0xff]  ;;  %p770_p1 = pneg %p769_p10 }
  0x62   : > { %611 = vmatpush1.bf16.msra.mxu0 %v610_v24  ;;  %v362_v47 = vld [vmem:[%s1060_s11 + $0xd8] sm:$0xff]  ;;  %v626_v48 = vpack.c.bf16 %v357_v45, %v355_v44  ;;  %v359_v50 = vld [vmem:[%s1060_s11 + $0xc0] sm:$0xff]  ;;  %v361_v51 = vld [vmem:[%s1060_s11 + $0xd0] sm:$0xff]  ;;  %v280_v4 = vsel %vm278_vm2, %v1070_v2, 4294967295  ;;  %v442_v29 = vunpack.c.l.s4 %v877_v28 }
  0x63   : > { %285 = vmax.xlane.f32.xlu0 %v284_v6  ;;  %613 = vmatprep.subr.bf16.mxu0 %v612_v25  ;;  %v628_v49 = vpack.c.bf16 %v362_v47, %v360_v46  ;;  %v364_v52 = vld [vmem:[%s1060_s11 + $0xe8] sm:$0xff]  ;;  %v366_v53 = vld [vmem:[%s1060_s11 + $0xf8] sm:$0xff]  ;;  %v630_v54 = vpack.c.bf16 %v361_v51, %v359_v50  ;;  %v363_v56 = vld [vmem:[%s1060_s11 + $0xe0] sm:$0xff]  ;;  %v296_v7 = vshra.s32 %v280_v4, 16  ;;  %v295_v16 = vand.u32 65535, %v280_v4 }
  0x64   : > { %v632_v55 = vpack.c.bf16 %v366_v53, %v364_v52  ;;  %v365_v57 = vld [vmem:[%s1060_s11 + $0xf0] sm:$0xff]  ;;  %v1133_v12 = vld [vmem:[#allocation2 + $0x8] sm:$0xff]  ;;  %s771_s11 = sshll.u32 %s878_s17, 4  ;;  %s772_s11 = int_to_ptr.vmem [resolvable:$false] %s771_s11 }
  0x65   : > { %v634_v58 = vpack.c.bf16 %v365_v57, %v363_v56  ;;  %v1131_v11 = vld [vmem:[#allocation2] sm:$0xff]  ;;  %v262_v14 = vrot.slane %v1133_v12, 1  ;;  %v297_v19 = vcvt.s32.f32 %v295_v16  ;;  %s773_s7 = scalar_lea.vmem %s772_s11, 64  ;;  %p774_p4 = scmp.lt.s32.totalorder %s1156_s23, %s772_s11 }
  0x66   : > { %615 = vmatpush1.bf16.msra.mxu0 %v614_v30  ;;  %v261_v13 = vrot.slane %v1131_v11, 1  ;;  %v443_v30 = vunpack.c.0.s8 %v442_v29  ;;  %p775_p7 = scmp.lt.s32.totalorder %s773_s7, %s767_s16 }
  0x67   : > { %617 = vmatprep.subr.bf16.mxu0 %v616_v31 }
  0x68   : > { %v266_v15 = vsel %vm265_vm5, %v261_v13, %v262_v14  ;;  %v446_v32 = vsub.s32 %v443_v30, %v1067_v1  ;;  %p776_p5 = por %p775_p7, %p774_p4 }
  0x6a   : > { %619 = vmatpush1.bf16.msra.mxu0 %v618_v36  ;;  %p777_p11 = pnand %p776_p5, %p770_p1 }
  0x6b   : > { %621 = vmatprep.subr.bf16.mxu0 %v620_v37 }
  0x6e   : > { %623 = vmatpush1.bf16.msra.mxu0 %v622_v42 }
  0x6f   : > { %625 = vmatprep.subr.bf16.mxu0 %v624_v43 }
  0x72   : > { %627 = vmatpush1.bf16.msra.mxu0 %v626_v48 }
  0x73   : > { %629 = vmatprep.subr.bf16.mxu0 %v628_v49 }
  0x76   : > { %631 = vmatpush1.bf16.msra.mxu0 %v630_v54 }
  0x77   : > { %633 = vmatprep.subr.bf16.mxu0 %v632_v55 }
  0x7a   : > { %635 = vmatpush1.bf16.msra.mxu0 %v634_v58 }
  0xf0   : > { %v1083_v9 = vpop.xlane.xlu0 %285 }
  0xf1   : > { %vm287_vm1 = vcmp.eq.f32.partialorder %v284_v6, %v1083_v9  ;;  %v292_v60 = vcvt.f32.s32 %v1083_v9  ;;  %v594_v6 = vld [vmem:[%s1227_s1] ss:$0 sm:$0xff]  ;;  %v298_v9 = vcvt.s32.f32 %v296_v7 }
  0xf2   : > { %v288_v10 = vsel %vm287_vm1, %v283_v8, -inf }
  0xf3   : > { %289 = vmax.xlane.f32.xlu0 %v288_v10  ;;  %v293_v62 = vshll.u32 %v292_v60, 16  ;;  %v876_v10 = vmov 0.0  }
  0xf4   : > { %431 = vmatprep.mubr.f32.mxu0 %v876_v10 }
 0x180   : > { %v290_v61 = vpop.xlane.xlu0 %289 }
 0x181   : > { %v291_v63 = vcvt.f32.s32 %v290_v61 }
 0x183   : > { %v294_v5 = vadd.s32 %v293_v62, %v291_v63 }
 0x185   : > { %vm311_vm3 = vcmp.eq.s32.totalorder %v1070_v2, %v294_v5  ;;  %vm309_vm6 = vcmp.ge.s32.totalorder %v294_v5, 0 }
 0x186   : > { %vm313_vm4 = vmand %vm277_vm0, %vm311_vm3 }
 0x187   : > { %v321_v8 = vsel %vm313_vm4, %v594_v6, 0.0 }
 0x188   : > { %323 = vadd.xlane.f32.xlu1 %v321_v8 }
 0x18c   : > { %299 = vmax.xlane.f32.xlu1 %v298_v9 }
 0x215   : > { %v324_v17 = vpop.xlane.xlu1 %323 }
 0x216   : > { %v331_v18 = vsel %vm309_vm6, %v324_v17, %v266_v15 }
 0x217   : > { %333 = vst [vmem:[#allocation8] sm:$0xff] %v331_v18  ;;  %432 = vmatmul.mubr.f32.vlgmr.msra.gmra.mrb[0].mxu0 %v331_v18 }
 0x219   : > { %v300_v20 = vpop.xlane.xlu1 %299 }
 0x21a   : > { %vm301_vm7 = vcmp.eq.f32.partialorder %v298_v9, %v300_v20  ;;  %v306_v22 = vcvt.f32.s32 %v300_v20 }
 0x21b   : > { %v302_v21 = vsel %vm301_vm7, %v297_v19, -inf }
 0x21c   : > { %303 = vmax.xlane.f32.xlu0 %v302_v21  ;;  %v307_v24 = vshll.u32 %v306_v22, 16 }
 0x2a9   : > { %v304_v23 = vpop.xlane.xlu0 %303 }
 0x2aa   : > { %v305_v25 = vcvt.f32.s32 %v304_v23 }
 0x2ac   : > { %v308_v26 = vadd.s32 %v307_v24, %v305_v25 }
 0x2ae   : > { %vm312_vm8 = vcmp.eq.s32.totalorder %v1070_v2, %v308_v26 }
 0x2af   : > { %vm314_vm9 = vmand %vm278_vm2, %vm312_vm8 }
 0x2b0   : > { %v322_v27 = vsel %vm314_vm9, %v594_v6, 0.0 }
 0x2b1   : > { %325 = vadd.xlane.f32.xlu1 %v322_v27 }
 0x2ea   : > { %v433_v31 = vpop.f32.mrb[0].mxu0 }
 0x2eb   : > { %v435_v33 = vpop.f32.mrb[1].mxu0 }
 0x2ec   : > { %v440_v34 = vcombine.low %v433_v31, %v435_v33 }
 0x2ee   : > { %v447_v2 = vrot.slane %v440_v34, %v446_v32 }
 0x2f0   : > { %v454_v3 = vrot.slane %v447_v2, %v446_v32 }
 0x2f2   : > { %460 = vst.msk [vmem:[%s254_s15] sm:$0x3] %vm458_vm10, %v454_v3 }
 0x2f3   : > { %780 = shalt.err (!%p777_p11)
}
 0x2f4   : > { %s781_s13 = scalar_lea.hbm %s1154_s8, 32  ;;  %s785_s25 = scalar_lea.hbm %s1230_s4, 64 }
 0x2f5   : > { %p782_p13 = scmp.ne.s32.totalorder %s1154_s8, %s781_s13  ;;  %p786_p12 = scmp.lt.u32.totalorder %s1154_s8, %s1230_s4 }
 0x2f6   : > { %p787_p3 = scmp.lt.u32.totalorder %s785_s25, %s781_s13  ;;  %p789_p8 = scmp.lt.u32.totalorder %s781_s13, %s1154_s8 }
 0x2f7   : > { %p783_p2 = pnand %p782_p13, %p1250_p9 }
 0x2f8   : > { %p788_p0 = por %p787_p3, %p786_p12 }
 0x2f9   : > { %p784_p6 = pneg %p783_p2 }
 0x2fa   : > { %p790_p10 = por %p789_p8, %p788_p0 }
 0x2fc   : > { %p791_p1 = pnand %p790_p10, %p784_p6 }
 0x2fe   : > { %794 = shalt.err (!%p791_p1)
}
 0x2ff   : > { %642 = dma.vmem_to_hbm [thread:$0]  (%p1250_p9), %s1156_s23, 32, %s1154_s8, %s462_s12   ;;  %v267_v0 = vsel %vm265_vm5, %v262_v14, %v261_v13  ;;  %vm310_vm11 = vcmp.ge.s32.totalorder %v308_v26, 0 }
 0x300   : > { %s879_s15 = smov [#allocation8]   ;;  %p1251_p7 = scmp.eq.s32.totalorder %s933_s22, 1 }
 0x301   : > { %s486_s9 = sshll.u32 %s879_s15, 4  ;;  %s487_s9 = int_to_ptr.vmem [resolvable:$true] %s486_s9 }
 0x302   : > { %s795_s26 = scalar_lea.vmem %s487_s9, 256  ;;  %p802_p9 = scmp.lt.s32.totalorder %s487_s9, %s487_s9 }
 0x303   : > { %p796_p4 = scmp.ne.s32.totalorder %s487_s9, %s795_s26  ;;  %p803_p13 = scmp.lt.s32.totalorder %s795_s26, %s795_s26 }
 0x305   : > { %p797_p5 = pnand %p796_p4, %p1251_p7  ;;  %p804_p2 = por %p803_p13, %p802_p9 }
 0x307   : > { %p798_p11 = pneg %p797_p5 }
 0x309   : > { %p805_p6 = pnand %p804_p2, %p798_p11 }
 0x33e   : > { %v326_v35 = vpop.xlane.xlu1 %325 }
 0x33f   : > { %v332_v36 = vsel %vm310_vm11, %v326_v35, %v267_v0 }
 0x340   : > { %334 = vst [vmem:[#allocation8 + $0x8] sm:$0xff] %v332_v36 }
 0x341   : > { %808 = shalt.err (!%p805_p6)
}
 0x342   : > { %s809_s8 = scalar_lea.hbm %s1231_s5, 256  ;;  %p1252_p3 = pmov %p1251_p7 }
 0x343   : > { %p810_p12 = scmp.ne.s32.totalorder %s1231_s5, %s809_s8  ;;  %p815_p10 = scmp.lt.u32.totalorder %s809_s8, %s1231_s5 }
 0x345   : > { %p811_p0 = pnand %p810_p12, %p1252_p3 }
 0x347   : > { %p812_p8 = pneg %p811_p0 }
 0x349   : > { %p817_p1 = pnand %p815_p10, %p812_p8 }
 0x34b   : > { %820 = shalt.err (!%p817_p1)
}
 0x34c   : > { %s880_s7 = smov 128   ;;  %s881_s13 = smov 8  }
 0x34d   : > { %p1253_p4 = pmov %p1252_p3  ;;  %p1254_p7 = pmov %p1252_p3 }
 0x34f   : > { %644 = dma.vmem_to_hbm [thread:$0]  (%p1253_p4), %s487_s9, 256, %s1231_s5, [#allocation9], %s880_s7, %s880_s7, %s881_s13  }
 0x350   : > { %846 = dma.done.wait (%p1254_p7), [#allocation9], 256   ;;  %p1255_p5 = pmov %p1252_p3 }
 0x352   : > { %848 = vsyncadd (%p1255_p5), [#allocation9], 4294967040 }
 0x353 PF: > { %s505_s25 = sand.u32 1, %s855_s18   ;;  %p1256_p11 = scmp.ne.s32.totalorder %s1240_s6, 0 }
 0x354   : > { %p1257_p9 = scmp.ge.s32.totalorder %s867_s21, 2  ;;  %s506_s28 = scalar_lea.sflag [#allocation4], %s505_s25 }
 0x356   : > { %p657_p13 = pnand %p1257_p9, %p1256_p11 }
 0x358   : > { %850 = dma.done.wait (!%p657_p13), %s506_s28, 32  }
 0x359   : > { %852 = vsyncadd (!%p657_p13), %s506_s28, 4294967264  ;;  %p21_p2 = scmp.ge.s32.totalorder %s937_s24, 4   ;;  %s1258_s18 = smov %s859_s19 }
 0x35a   : > { %s1259_s19 = smov %s863_s20  ;;  %s1260_s20 = smov %s949_s27 }
 0x35b   : > { %s1261_s21 = smov %s937_s24  ;;  %23 = sbr.rel (!%p21_p2) target bundleno = 7 (0x7), region = 94 }
 0x362   :  { %511 = vsyncpa [#allocation3], 1 }
 0x363   :  { %513 = vsyncpa [#allocation3 + $0x1], 1 }
 0x364   :  { %514 = vsyncpa [#allocation6], 1 }
 0x365   :  { %516 = vsyncpa [#allocation6 + $0x1], 1 }
 0x366   :  { %517 = vsyncpa [#allocation4], 1 }
 0x367   :  { %519 = vsyncpa [#allocation4 + $0x1], 1 }
 0x368   :  { %520 = vsyncpa [#allocation9], 1 }

</bundles_post_ra>
